<compile_context>
chip_gen: v5e
topology: v5e:2x2
jax: 0.10.0
libtpu: 0.0.40
codegen_flags: <defaults>
</compile_context>

<pallas_src>
import functools

import jax
import jax.numpy as jnp
from jax.experimental import pallas as pl
from jax.experimental.pallas import tpu as pltpu

# ---------------- model hyper-params (small, consistent with the module) ---
FEATURES = 4                      # train_x.shape[1]
NUM_UNITS = 32                    # args.units
NUM_STEPS = 16                    # args.num_steps
AUG = NUM_UNITS + NUM_STEPS       # 48 : [activation | one-hot] augmented width
NUM_HIDDEN = 3                    # three (Linear + embedding + ReLU) blocks
TILE_B = 128                      # batch rows per grid step (matches v5e MXU M)


def diffusion_kernel(x_ref, t_ref, slab_ref, o_ref):
    """One batch tile of the whole 4-layer forward.

    x_ref    : VMEM (tile_b, AUG) f32   -- x in lanes 0:FEATURES, zeros elsewhere
    t_ref    : VMEM (tile_b, 1)  int32  -- diffusion step per row
    slab_ref : VMEM (4, AUG, AUG) f32   -- fused [[W_i, 0], [E_i+b_i, I]] blocks
    o_ref    : VMEM (tile_b, AUG) f32   -- output (cols 0:FEATURES valid)
    """
    b_sz = x_ref.shape[0]

    # one-hot(t) built directly in lanes NUM_UNITS:AUG with a single compare
    lane = jax.lax.broadcasted_iota(jnp.int32, (b_sz, AUG), 1) - NUM_UNITS
    onehot = (t_ref[...] == lane).astype(jnp.float32)          # (tile_b, AUG)

    # augmented activation [x | one-hot]; lives in vregs, no scratch round-trip
    h = x_ref[...] + onehot

    # 3 fused (Linear + step-embedding + bias) + ReLU layers: 1 matmul each.
    # The identity block in the weight slab carries the one-hot lanes through
    # unchanged (ReLU of 0/1 is a no-op), so no per-layer re-assembly is needed.
    for i in range(NUM_HIDDEN):
        h = jnp.maximum(
            jnp.dot(h, slab_ref[i], preferred_element_type=jnp.float32), 0.0)

    # output layer: bias b3 folded through the one-hot rows (they sum to 1)
    o_ref[...] = jnp.dot(h, slab_ref[NUM_HIDDEN],
                         preferred_element_type=jnp.float32)


def _tiling(batch):
    """(tile_b, padded_batch) honoring the 8-sublane constraint."""
    if batch <= TILE_B:
        tile_b = max(8, ((batch + 7) // 8) * 8)
        return tile_b, tile_b
    b_pad = ((batch + TILE_B - 1) // TILE_B) * TILE_B
    return TILE_B, b_pad


@jax.jit
def diffusion_forward(x, t, slab):
    """x: (B, FEATURES) f32, t: (B,) int, slab: (4, AUG, AUG) f32."""
    batch = x.shape[0]
    tile_b, b_pad = _tiling(batch)
    n_tiles = pl.cdiv(b_pad, tile_b)

    # clamp t (out-of-range would silently drop embeddings + folded biases)
    t_c = jnp.clip(t.astype(jnp.int32), 0, NUM_STEPS - 1)

    # lane-aligned augmented input: x in lanes 0:FEATURES, zeros elsewhere
    x_aug = jnp.zeros((b_pad, AUG), jnp.float32).at[:batch, :FEATURES].set(x)
    t_col = jnp.zeros((b_pad, 1), jnp.int32).at[:batch, 0].set(t_c)

    out = pl.pallas_call(
        diffusion_kernel,
        out_shape=jax.ShapeDtypeStruct((b_pad, AUG), jnp.float32),
        grid_spec=pltpu.PrefetchScalarGridSpec(
            num_scalar_prefetch=0,
            grid=(n_tiles,),
            in_specs=[
                pl.BlockSpec((tile_b, AUG), lambda i: (i, 0)),      # x (augmented)
                pl.BlockSpec((tile_b, 1), lambda i: (i, 0)),        # t column
                pl.BlockSpec((4, AUG, AUG), lambda i: (0, 0, 0)),   # slab, resident
            ],
            out_specs=pl.BlockSpec((tile_b, AUG), lambda i: (i, 0)),
        ),
        compiler_params=pltpu.CompilerParams(
            dimension_semantics=("parallel",)),                     # v7x: 2 TCs split batch
    )(x_aug, t_col, slab)

    # real features live in the first FEATURES lanes
    return out[:batch, :FEATURES]


def init_params(key):
    """Raw parameters matching the PyTorch module's shapes.

    Linear weights stored as (in_dim, out_dim); biases as (1, out_dim);
    embedding tables as (num_steps, num_units).
    """
    ks = jax.random.split(key, 7)

    def lin(k, fan_in, fan_out):
        bound = 1.0 / jnp.sqrt(fan_in)
        kw, kb = jax.random.split(k)
        w = jax.random.uniform(kw, (fan_in, fan_out), jnp.float32, -bound, bound)
        b = jax.random.uniform(kb, (1, fan_out), jnp.float32, -bound, bound)
        return w, b

    w0, b0 = lin(ks[0], FEATURES, NUM_UNITS)
    w1, b1 = lin(ks[1], NUM_UNITS, NUM_UNITS)
    w2, b2 = lin(ks[2], NUM_UNITS, NUM_UNITS)
    w3, b3 = lin(ks[3], NUM_UNITS, FEATURES)

    e0 = jax.random.normal(ks[4], (NUM_STEPS, NUM_UNITS), jnp.float32)
    e1 = jax.random.normal(ks[5], (NUM_STEPS, NUM_UNITS), jnp.float32)
    e2 = jax.random.normal(ks[6], (NUM_STEPS, NUM_UNITS), jnp.float32)

    return (w0, b0, e0, w1, b1, e1, w2, b2, e2, w3, b3)


def pack_params(params):
    """One-time restructuring: fuse each layer's Linear + embedding + bias into
    a single (AUG, AUG) matmul operand whose bottom-right identity block carries
    the one-hot lanes through; stack into one f32 slab (4, AUG, AUG).

    (For bf16 MXU operands — review item 5 — return .astype(jnp.bfloat16).)
    """
    (w0, b0, e0, w1, b1, e1, w2, b2, e2, w3, b3) = params
    eye = jnp.eye(NUM_STEPS, dtype=jnp.float32)

    def fuse_hidden(w, b, e):
        top = jnp.zeros((NUM_UNITS, AUG), jnp.float32)
        top = top.at[: w.shape[0], :NUM_UNITS].set(w)           # W (zero-pad rows)
        bot = jnp.zeros((NUM_STEPS, AUG), jnp.float32)
        bot = bot.at[:, :NUM_UNITS].set(e + b)                  # E + bias
        bot = bot.at[:, NUM_UNITS:].set(eye)                    # one-hot pass-through
        return jnp.concatenate([top, bot], axis=0)              # (AUG, AUG)

    m0 = fuse_hidden(w0, b0, e0)
    m1 = fuse_hidden(w1, b1, e1)
    m2 = fuse_hidden(w2, b2, e2)

    # final layer: W3 in cols 0:FEATURES; b3 replicated across the one-hot rows
    top3 = jnp.zeros((NUM_UNITS, AUG), jnp.float32).at[:, :FEATURES].set(w3)
    bot3 = jnp.zeros((NUM_STEPS, AUG), jnp.float32).at[:, :FEATURES].set(
        jnp.broadcast_to(b3, (NUM_STEPS, FEATURES)))
    m3 = jnp.concatenate([top3, bot3], axis=0)                   # (AUG, AUG)

    return jnp.stack([m0, m1, m2, m3], axis=0)                   # (4, AUG, AUG)


def reference_forward(x, t, params):
    """Pure-JAX reference matching the PyTorch module's forward."""
    (w0, b0, e0, w1, b1, e1, w2, b2, e2, w3, b3) = params
    for w, b, e in ((w0, b0, e0), (w1, b1, e1), (w2, b2, e2)):
        x = x @ w + b
        x = x + e[t]
        x = jnp.maximum(x, 0.0)
    return x @ w3 + b3
    # TODO(synk): the PyTorch forward also copies t_embedding to host
    # (.cpu().detach().numpy()) without using it; that side-effect has no
    # device-kernel equivalent and is intentionally omitted.


if __name__ == "__main__":
    key = jax.random.PRNGKey(0)
    kx, kt, kp, kx2, kt2 = jax.random.split(key, 5)

    params = init_params(kp)
    slab = jax.block_until_ready(pack_params(params))   # packed once at init time

    # small batch (single grid step)
    x = jax.random.normal(kx, (8, FEATURES), jnp.float32)
    t = jax.random.randint(kt, (8,), 0, NUM_STEPS, jnp.int32)
    out = jax.block_until_ready(diffusion_forward(x, t, slab))
    ref = reference_forward(x, t, params)
    assert out.shape == (8, FEATURES)
    assert jnp.allclose(out, ref, atol=1e-5, rtol=1e-5), "mismatch vs reference (B=8)"

    # larger batch exercising the batch-tile grid (3 tiles of 128, padded)
    x2 = jax.random.normal(kx2, (300, FEATURES), jnp.float32)
    t2 = jax.random.randint(kt2, (300,), 0, NUM_STEPS, jnp.int32)
    out2 = jax.block_until_ready(diffusion_forward(x2, t2, slab))
    ref2 = reference_forward(x2, t2, params)
    assert out2.shape == (300, FEATURES)
    assert jnp.allclose(out2, ref2, atol=1e-5, rtol=1e-5), "mismatch vs reference (B=300)"

    print("KERNEL_OK")
</pallas_src>

<mosaic_0001>
module attributes {stable_mosaic.version = 11 : i64} {
  func.func @diffusion_kernel(%arg0: i32, %arg1: memref<8x48xf32, #tpu.memory_space<vmem>>, %arg2: memref<8x1xi32, #tpu.memory_space<vmem>>, %arg3: memref<4x48x48xf32, #tpu.memory_space<vmem>>, %arg4: memref<8x48xf32, #tpu.memory_space<vmem>>) attributes {dimension_semantics = [#tpu.dimension_semantics<parallel>], iteration_bounds = array<i64: 1>, scalar_prefetch = 0 : i64, scratch_operands = 0 : i64, tpu.core_type = #tpu.core_type<tc>, window_params = [{transform_indices = @transform_0, window_bounds = array<i64: 8, 48>}, {transform_indices = @transform_1, window_bounds = array<i64: 8, 1>}, {pipeline_mode = #tpu.pipeline_mode<synchronous>, transform_indices = @transform_2, window_bounds = array<i64: 4, 48, 48>}, {transform_indices = @transform_3, window_bounds = array<i64: 8, 48>}]} {
    %0 = tpu.iota {dimensions = array<i32: 1>} : vector<8x48xi32>
    %c32_i32 = arith.constant 32 : i32
    %1 = vector.broadcast %c32_i32 : i32 to vector<8x48xi32>
    %2 = arith.subi %0, %1 : vector<8x48xi32>
    %c0 = arith.constant 0 : index
    %c0_0 = arith.constant 0 : index
    %3 = vector.load %arg2[%c0, %c0_0] : memref<8x1xi32, #tpu.memory_space<vmem>>, vector<8x1xi32>
    %4 = vector.broadcast %3 : vector<8x1xi32> to vector<8x48xi32>
    %5 = arith.cmpi eq, %4, %2 : vector<8x48xi32>
    %6 = arith.extui %5 : vector<8x48xi1> to vector<8x48xi32>
    %7 = arith.sitofp %6 : vector<8x48xi32> to vector<8x48xf32>
    %c0_1 = arith.constant 0 : index
    %c0_2 = arith.constant 0 : index
    %8 = vector.load %arg1[%c0_1, %c0_2] : memref<8x48xf32, #tpu.memory_space<vmem>>, vector<8x48xf32>
    %9 = arith.addf %8, %7 : vector<8x48xf32>
    %c0_3 = arith.constant 0 : index
    %c0_4 = arith.constant 0 : index
    %c0_5 = arith.constant 0 : index
    %10 = vector.load %arg3[%c0_3, %c0_4, %c0_5] : memref<4x48x48xf32, #tpu.memory_space<vmem>>, vector<1x48x48xf32>
    %11 = vector.shape_cast %10 : vector<1x48x48xf32> to vector<48x48xf32>
    %cst = arith.constant dense<0.000000e+00> : vector<8x48xf32>
    %12 = tpu.matmul %9, %11, %cst {dimension_numbers = #tpu.dot_dimension_numbers<[1], [0], [0], [1], [0, 0, 1, 1], [], []>} : vector<8x48xf32>, vector<48x48xf32>, vector<8x48xf32> -> vector<8x48xf32>
    %cst_6 = arith.constant 0.000000e+00 : f32
    %13 = vector.broadcast %cst_6 : f32 to vector<8x48xf32>
    %14 = arith.maximumf %12, %13 : vector<8x48xf32>
    %c1 = arith.constant 1 : index
    %c0_7 = arith.constant 0 : index
    %c0_8 = arith.constant 0 : index
    %15 = vector.load %arg3[%c1, %c0_7, %c0_8] : memref<4x48x48xf32, #tpu.memory_space<vmem>>, vector<1x48x48xf32>
    %16 = vector.shape_cast %15 : vector<1x48x48xf32> to vector<48x48xf32>
    %cst_9 = arith.constant dense<0.000000e+00> : vector<8x48xf32>
    %17 = tpu.matmul %14, %16, %cst_9 {dimension_numbers = #tpu.dot_dimension_numbers<[1], [0], [0], [1], [0, 0, 1, 1], [], []>} : vector<8x48xf32>, vector<48x48xf32>, vector<8x48xf32> -> vector<8x48xf32>
    %cst_10 = arith.constant 0.000000e+00 : f32
    %18 = vector.broadcast %cst_10 : f32 to vector<8x48xf32>
    %19 = arith.maximumf %17, %18 : vector<8x48xf32>
    %c2 = arith.constant 2 : index
    %c0_11 = arith.constant 0 : index
    %c0_12 = arith.constant 0 : index
    %20 = vector.load %arg3[%c2, %c0_11, %c0_12] : memref<4x48x48xf32, #tpu.memory_space<vmem>>, vector<1x48x48xf32>
    %21 = vector.shape_cast %20 : vector<1x48x48xf32> to vector<48x48xf32>
    %cst_13 = arith.constant dense<0.000000e+00> : vector<8x48xf32>
    %22 = tpu.matmul %19, %21, %cst_13 {dimension_numbers = #tpu.dot_dimension_numbers<[1], [0], [0], [1], [0, 0, 1, 1], [], []>} : vector<8x48xf32>, vector<48x48xf32>, vector<8x48xf32> -> vector<8x48xf32>
    %cst_14 = arith.constant 0.000000e+00 : f32
    %23 = vector.broadcast %cst_14 : f32 to vector<8x48xf32>
    %24 = arith.maximumf %22, %23 : vector<8x48xf32>
    %c3 = arith.constant 3 : index
    %c0_15 = arith.constant 0 : index
    %c0_16 = arith.constant 0 : index
    %25 = vector.load %arg3[%c3, %c0_15, %c0_16] : memref<4x48x48xf32, #tpu.memory_space<vmem>>, vector<1x48x48xf32>
    %26 = vector.shape_cast %25 : vector<1x48x48xf32> to vector<48x48xf32>
    %cst_17 = arith.constant dense<0.000000e+00> : vector<8x48xf32>
    %27 = tpu.matmul %24, %26, %cst_17 {dimension_numbers = #tpu.dot_dimension_numbers<[1], [0], [0], [1], [0, 0, 1, 1], [], []>} : vector<8x48xf32>, vector<48x48xf32>, vector<8x48xf32> -> vector<8x48xf32>
    %c0_18 = arith.constant 0 : index
    %c0_19 = arith.constant 0 : index
    %28 = vector.load %arg4[%c0_18, %c0_19] : memref<8x48xf32, #tpu.memory_space<vmem>>, vector<8x48xf32>
    tpu.vector_store %arg4[%c0_18, %c0_19], %27 {strides = array<i32>} : memref<8x48xf32, #tpu.memory_space<vmem>>, vector<8x48xf32>,
    return
  }
  func.func @transform_0(%arg0: i32) -> (i32, i32) {
    %c0_i32 = arith.constant 0 : i32
    %c0_i32_0 = arith.constant 0 : i32
    return %arg0, %c0_i32 : i32, i32
  }
  func.func @transform_1(%arg0: i32) -> (i32, i32) {
    %c0_i32 = arith.constant 0 : i32
    %c0_i32_0 = arith.constant 0 : i32
    return %arg0, %c0_i32 : i32, i32
  }
  func.func @transform_2(%arg0: i32) -> (i32, i32, i32) {
    %c0_i32 = arith.constant 0 : i32
    %c0_i32_0 = arith.constant 0 : i32
    %c0_i32_1 = arith.constant 0 : i32
    %c0_i32_2 = arith.constant 0 : i32
    return %c0_i32, %c0_i32_0, %c0_i32_1 : i32, i32, i32
  }
  func.func @transform_3(%arg0: i32) -> (i32, i32) {
    %c0_i32 = arith.constant 0 : i32
    %c0_i32_0 = arith.constant 0 : i32
    return %arg0, %c0_i32 : i32, i32
  }
}

</mosaic_0001>

<bundles_post_ra>
// kernel: diffusion_forward.1
= control target key start
LH: loop header
LB: loop body
LE: loop exit
PB: predicated region body
PF: predicated region fallthrough
CT: control target
= control target key end

     0   :  { %8 = vsyncpa [#allocation3], 0  ;;  %s209_s15 = smov [#allocation2]   ;;  %s210_s17 = smov 128   ;;  %s251_s0 = inlined_call_operand.vmem [shape: f32[8,48], index: 0, kind: input, shape index: {}]   ;;  %s252_s1 = inlined_call_operand.vmem [shape: s32[8,1], index: 1, kind: input, shape index: {}]   ;;  %s253_s2 = inlined_call_operand.hbm [shape: f32[4,48,48], index: 2, kind: input, shape index: {}]   ;;  %s254_s3 = inlined_call_operand.vmem [shape: f32[8,48], index: 3, kind: output, shape index: {}]  }
   0x1   :  { %s17_s14 = sshll.u32 %s253_s2, 4  ;;  %s19_s16 = sshll.u32 %s209_s15, 4  ;;  %s18_s14 = int_to_ptr.hbm [resolvable:$true] %s17_s14  ;;  %s20_s16 = int_to_ptr.vmem [resolvable:$true] %s19_s16 }
   0x2   :  { %s211_s18 = smov 8  }
   0x3   :  { %25 = dma.hbm_to_vmem [thread:$0]  %s18_s14, 3072, %s20_s16, [#allocation3], %s210_s17, %s210_s17, %s211_s18  }
   0x4   :  { %207 = dma.done.wait [#allocation3], 3072  }
   0x5   :  { %208 = vsyncadd [#allocation3], 4294964224  ;;  %v212_v0 = vmov 0   ;;  %v33_v1 = vld [vmem:[%s252_s1] sm:$0xff]  ;;  %v47_v2 = vld [vmem:[#allocation2 + $0x28] sm:$0xff]  ;;  %v30_v12 = vlaneseq  ;;  %v213_v17 = vmov 0.0  }
   0x6   :  { %182 = vset.pattern.permute.xlu0 %v212_v0  ;;  %v46_v3 = vld [vmem:[#allocation2 + $0x20] sm:$0xff]  ;;  %62 = vmatpush.msra.mxu0 %v47_v2  ;;  %v45_v4 = vld [vmem:[#allocation2 + $0x18] sm:$0xff]  ;;  %v44_v5 = vld [vmem:[#allocation2 + $0x10] sm:$0xff]  ;;  %vm48_vm1 = vcmask 392192  }
   0x7   :  { %35 = vperm.xlu0 %182, %v33_v1   ;;  %v43_v6 = vld [vmem:[#allocation2 + $0x8] sm:$0xff]  ;;  %v42_v7 = vld [vmem:[#allocation2] sm:$0xff]  ;;  %v79_v8 = vld [vmem:[#allocation2 + $0x58] sm:$0xff]  ;;  %v31_v13 = vand.u32 127, %v30_v12 }
   0x8   :  { %63 = vmatpush.msra.mxu0 %v46_v3  ;;  %v78_v9 = vld [vmem:[#allocation2 + $0x50] sm:$0xff]  ;;  %93 = vmatpush.msra.mxu1 %v79_v8  ;;  %v77_v10 = vld [vmem:[#allocation2 + $0x48] sm:$0xff]  ;;  %v76_v11 = vld [vmem:[#allocation2 + $0x40] sm:$0xff] }
   0x9   :  { %v171_v14 = vadd.s32 4294967264, %v31_v13  ;;  %v40_v15 = vld [vmem:[%s251_s0] sm:$0xff]  ;;  %v75_v20 = vld [vmem:[#allocation2 + $0x38] sm:$0xff]  ;;  %v74_v21 = vld [vmem:[#allocation2 + $0x30] sm:$0xff] }
   0xa   :  { %64 = vmatpush.msra.mxu0 %v45_v4  ;;  %94 = vmatpush.msra.mxu1 %v78_v9  ;;  %v110_v22 = vld [vmem:[#allocation2 + $0x88] sm:$0xff]  ;;  %v109_v23 = vld [vmem:[#allocation2 + $0x80] sm:$0xff]  ;;  %v108_v24 = vld [vmem:[#allocation2 + $0x78] sm:$0xff] }
   0xb   :  { %124 = vmatpush.msra.mxu2 %v110_v22  ;;  %v107_v25 = vld [vmem:[#allocation2 + $0x70] sm:$0xff]  ;;  %v106_v28 = vld [vmem:[#allocation2 + $0x68] sm:$0xff]  ;;  %v105_v29 = vld [vmem:[#allocation2 + $0x60] sm:$0xff] }
   0xc   :  { %65 = vmatpush.msra.mxu0 %v44_v5  ;;  %95 = vmatpush.msra.mxu1 %v77_v10  ;;  %v141_v30 = vld [vmem:[#allocation2 + $0xb8] sm:$0xff]  ;;  %v140_v31 = vld [vmem:[#allocation2 + $0xb0] sm:$0xff]  ;;  %v139_v32 = vld [vmem:[#allocation2 + $0xa8] sm:$0xff] }
   0xd   :  { %125 = vmatpush.msra.mxu2 %v109_v23  ;;  %155 = vmatpush.msra.mxu3 %v141_v30  ;;  %v138_v33 = vld [vmem:[#allocation2 + $0xa0] sm:$0xff]  ;;  %v137_v36 = vld [vmem:[#allocation2 + $0x98] sm:$0xff]  ;;  %v136_v37 = vld [vmem:[#allocation2 + $0x90] sm:$0xff] }
   0xe   :  { %66 = vmatpush.msra.mxu0 %v43_v6  ;;  %96 = vmatpush.msra.mxu1 %v76_v11 }
   0xf   :  { %126 = vmatpush.msra.mxu2 %v108_v24  ;;  %156 = vmatpush.msra.mxu3 %v140_v31 }
  0x10   :  { %67 = vmatpush.msra.mxu0 %v42_v7  ;;  %97 = vmatpush.msra.mxu1 %v75_v20 }
  0x11   :  { %127 = vmatpush.msra.mxu2 %v107_v25  ;;  %157 = vmatpush.msra.mxu3 %v139_v32 }
  0x12   :  { %98 = vmatpush.msra.mxu1 %v74_v21 }
  0x13   :  { %128 = vmatpush.msra.mxu2 %v106_v28  ;;  %158 = vmatpush.msra.mxu3 %v138_v33 }
  0x15   :  { %129 = vmatpush.msra.mxu2 %v105_v29  ;;  %159 = vmatpush.msra.mxu3 %v137_v36 }
  0x17   :  { %160 = vmatpush.msra.mxu3 %v136_v37 }
  0x79   :  { %v36_v16 = vpop.permute.xlu0 %35 }
  0x7a   :  { %vm37_vm0 = vcmp.eq.s32.totalorder %v36_v16, %v171_v14 }
  0x7b   :  { %v172_v18 = vsel %vm37_vm0, 1.0, %v213_v17 }
  0x7c   :  { %v41_v19 = vadd.f32 %v172_v18, %v40_v15 }
  0x7e   :  { %173 = vmatmul.msk.f32.vlgmr.msra.gmra.mxu0 %vm48_vm1, %v41_v19 }
  0xfb   :  { %v69_v26 = vpop.f32.mrf.mxu0 }
  0xfc   :  { %v72_v27 = vmax.f32 %v69_v26, 0.0 }
  0xfe   :  { %174 = vmatmul.msk.f32.vlgmr.msra.gmra.mxu1 %vm48_vm1, %v72_v27 }
 0x17b   :  { %v100_v34 = vpop.f32.mrf.mxu1 }
 0x17c   :  { %v103_v35 = vmax.f32 %v100_v34, 0.0 }
 0x17e   :  { %175 = vmatmul.msk.f32.vlgmr.msra.gmra.mxu2 %vm48_vm1, %v103_v35 }
 0x201   :  { %v131_v38 = vpop.f32.mrf.mxu2 }
 0x202   :  { %v134_v39 = vmax.f32 %v131_v38, 0.0 }
 0x204   :  { %176 = vmatmul.msk.f32.vlgmr.msra.gmra.mxu3 %vm48_vm1, %v134_v39 }
 0x287   :  { %v162_v40 = vpop.f32.mrf.mxu3 }
 0x288   :  { %165 = vst.msk [vmem:[%s254_s3] sm:$0xff] %vm48_vm1, %v162_v40 }
 0x289   :  { %170 = vsyncpa [#allocation3], 1 }

</bundles_post_ra>
